<compile_context>
chip_gen: v7x
topology: tpu7x:2x2x1
jax: 0.10.0
libtpu: 0.0.40
codegen_flags: <defaults>
</compile_context>

<pallas_src>
import jax
import jax.numpy as jnp
from jax.experimental import pallas as pl
from jax.experimental.pallas import tpu as pltpu

_NEG = -1e30  # effectively -inf for padded class columns (exp underflows to 0)


def _round_up(a: int, b: int) -> int:
    return (a + b - 1) // b * b


def _resident_kernel(x_ref, w_ref, b_ref, o_ref):
    # x_ref: (TB, D)   w_ref: (D, Cp) resident   b_ref: (1, Cp) f32
    # o_ref: (TB, Cp)
    logits = jnp.dot(x_ref[...], w_ref[...], preferred_element_type=jnp.float32)
    logits = logits + b_ref[...]
    m = jnp.max(logits, axis=-1, keepdims=True)
    shifted = logits - m
    lse = jnp.log(jnp.sum(jnp.exp(shifted), axis=-1, keepdims=True))
    o_ref[...] = (shifted - lse).astype(o_ref.dtype)


def _streaming_kernel(x_ref, w_ref, b_ref, o_ref, acc_ref):
    # x_ref: (TB, TK)  w_ref: (TK, Cp)  b_ref: (1, Cp) f32
    # o_ref: (TB, Cp)  acc_ref: (TB, Cp) f32, persistent across the K axis.
    k = pl.program_id(1)

    @pl.when(k == 0)
    def _():
        acc_ref[...] = jnp.zeros_like(acc_ref)

    acc_ref[...] += jnp.dot(x_ref[...], w_ref[...],
                            preferred_element_type=jnp.float32)

    @pl.when(k == pl.num_programs(1) - 1)
    def _():
        logits = acc_ref[...] + b_ref[...]
        m = jnp.max(logits, axis=-1, keepdims=True)
        shifted = logits - m
        lse = jnp.log(jnp.sum(jnp.exp(shifted), axis=-1, keepdims=True))
        o_ref[...] = (shifted - lse).astype(o_ref.dtype)


def linear_logsoftmax(x, weight, bias, *, tb_max=1024, tk_max=512,
                      vmem_budget_bytes=None):
    """x: (B, D), weight: (D, C) [= torch weight.T], bias: (C,) -> (B, C)."""
    B, D = x.shape
    D_w, C = weight.shape
    assert D_w == D and bias.shape == (C,)

    out_dtype = x.dtype
    x_sz = jnp.dtype(x.dtype).itemsize
    w_sz = jnp.dtype(weight.dtype).itemsize
    o_sz = jnp.dtype(out_dtype).itemsize

    C_pad = _round_up(C, 128)

    # ---- VMEM budgeting (v5e/v6e: 128 MiB, v7x: 64 MiB) ---------------------
    try:
        info = pltpu.get_tpu_info()
        vmem_cap = int(getattr(info, "vmem_capacity_bytes", 64 * 1024 * 1024))
    except Exception:
        vmem_cap = 64 * 1024 * 1024
    vmem_cap = max(vmem_cap, 32 * 1024 * 1024)
    vmem_limit = int(vmem_cap * 0.85)
    budget = (int(vmem_cap * 0.6) if vmem_budget_bytes is None
              else int(vmem_budget_bytes))

    # ---- one-time (small) parameter padding ---------------------------------
    w_p = weight if C_pad == C else jnp.pad(weight, ((0, 0), (0, C_pad - C)))
    b_p = bias.astype(jnp.float32).reshape(1, C)
    if C_pad != C:
        # Padded class columns get a -inf-like bias; padded W columns are 0, so
        # acc + bias is already ~-inf there -> no mask needed in the epilogue.
        b_p = jnp.pad(b_p, ((0, 0), (0, C_pad - C)), constant_values=_NEG)

    def _pick_tb(tb_fit):
        TB = min(tb_max, int(tb_fit), _round_up(B, 8))
        if B >= 16:
            # Keep >= 2 batch tiles so the "parallel" axis can shard across
            # both TensorCores on v7x (megacore).
            TB = min(TB, _round_up(pl.cdiv(B, 2), 8))
        TB = max(8, TB // 8 * 8)
        if TB >= B:
            TB = B  # single full tile (block dim == array dim is always legal)
        return TB

    # ---- resident-W path -----------------------------------------------------
    # Conservative: count 2 pipeline buffers for every BlockSpec'd operand.
    resident_fixed = 2 * D * C_pad * w_sz + 2 * C_pad * 4
    resident_per_row = 2 * D * x_sz + 2 * C_pad * o_sz
    tb_fit = ((budget - resident_fixed) // resident_per_row
              if budget > resident_fixed else 0)

    if tb_fit >= min(B, 8):
        TB = _pick_tb(tb_fit)
        grid_b = pl.cdiv(B, TB)
        cost = pl.CostEstimate(
            flops=2 * B * D * C_pad,
            transcendentals=B * C_pad,
            bytes_accessed=(B * D * x_sz + D * C_pad * w_sz
                            + B * C_pad * o_sz + C_pad * 4),
        )
        out = pl.pallas_call(
            _resident_kernel,
            out_shape=jax.ShapeDtypeStruct((B, C_pad), out_dtype),
            grid_spec=pltpu.PrefetchScalarGridSpec(
                num_scalar_prefetch=0,
                grid=(grid_b,),
                in_specs=[
                    pl.BlockSpec((TB, D), lambda i: (i, 0)),      # x (pipelined)
                    pl.BlockSpec((D, C_pad), lambda i: (0, 0)),   # W (resident, 1 DMA)
                    pl.BlockSpec((1, C_pad), lambda i: (0, 0)),   # bias (resident)
                ],
                out_specs=pl.BlockSpec((TB, C_pad), lambda i: (i, 0)),
            ),
            compiler_params=pltpu.CompilerParams(
                dimension_semantics=("parallel",),
                vmem_limit_bytes=vmem_limit,
            ),
            cost_estimate=cost,
        )(x, w_p, b_p)
    else:
        # ---- streaming fallback: W does not fit in VMEM ----------------------
        # TODO(synk): add a class-axis grid (online / two-pass logsumexp) for
        # very large nclass; for now TK/TB are shrunk, which stays correct.
        TK = max(128, (min(tk_max, _round_up(D, 128)) // 128) * 128)
        while TK > 128 and 2 * TK * C_pad * w_sz > budget // 2:
            TK = max(128, ((TK // 2) // 128) * 128)
        rem = budget - 2 * TK * C_pad * w_sz - 2 * C_pad * 4
        per_row = 2 * TK * x_sz + 2 * C_pad * o_sz + C_pad * 4
        tb_fit = rem // per_row if rem > 0 else 0
        TB = _pick_tb(max(8, tb_fit))
        D_pad = _round_up(D, TK)
        # K-axis zero padding is exact for the matmul (batch is never padded).
        x_p = x if D_pad == D else jnp.pad(x, ((0, 0), (0, D_pad - D)))
        grid = (pl.cdiv(B, TB), D_pad // TK)
        cost = pl.CostEstimate(
            flops=2 * B * D_pad * C_pad,
            transcendentals=B * C_pad,
            bytes_accessed=(B * D_pad * x_sz
                            + grid[0] * D_pad * C_pad * w_sz  # W re-streamed / batch tile
                            + B * C_pad * o_sz + C_pad * 4),
        )
        out = pl.pallas_call(
            _streaming_kernel,
            out_shape=jax.ShapeDtypeStruct((B, C_pad), out_dtype),
            grid_spec=pltpu.PrefetchScalarGridSpec(
                num_scalar_prefetch=0,
                grid=grid,
                in_specs=[
                    pl.BlockSpec((TB, TK), lambda i, k: (i, k)),     # x tile
                    pl.BlockSpec((TK, C_pad), lambda i, k: (k, 0)),  # W K-tile
                    pl.BlockSpec((1, C_pad), lambda i, k: (0, 0)),   # bias (resident)
                ],
                out_specs=pl.BlockSpec((TB, C_pad), lambda i, k: (i, 0)),
                scratch_shapes=[pltpu.VMEM((TB, C_pad), jnp.float32)],
            ),
            compiler_params=pltpu.CompilerParams(
                dimension_semantics=("parallel", "arbitrary"),
                vmem_limit_bytes=vmem_limit,
            ),
            cost_estimate=cost,
        )(x_p, w_p, b_p)

    return out if C_pad == C else out[:, :C]


if __name__ == "__main__":
    key = jax.random.PRNGKey(0)
    kx, kw, kb, kx2, kw2, kb2 = jax.random.split(key, 6)

    # Small shapes consistent with the module forward: x is (batch, input_dim).
    batch, input_dim, nclass = 8, 32, 16
    x = jax.random.normal(kx, (batch, input_dim), dtype=jnp.float32)
    bound = 1.0 / (input_dim ** 0.5)  # nn.Linear default init range
    # Stored already transposed: (input_dim, nclass) == torch weight.T
    weight = jax.random.uniform(kw, (input_dim, nclass), jnp.float32, -bound, bound)
    bias = jax.random.uniform(kb, (nclass,), jnp.float32, -bound, bound)

    out = jax.block_until_ready(linear_logsoftmax(x, weight, bias))
    ref = jax.nn.log_softmax(x @ weight + bias, axis=1)
    assert out.shape == (batch, nclass)
    assert jnp.allclose(out, ref, atol=1e-5, rtol=1e-5), float(
        jnp.max(jnp.abs(out - ref)))

    # Also exercise the streaming fallback (class padding, K tiling, f32
    # accumulator) by forcing a tiny VMEM budget.
    b2, d2, c2 = 24, 256, 130
    x2 = jax.random.normal(kx2, (b2, d2), dtype=jnp.float32)
    w2 = jax.random.uniform(kw2, (d2, c2), jnp.float32, -0.1, 0.1)
    bi2 = jax.random.uniform(kb2, (c2,), jnp.float32, -0.1, 0.1)
    out2 = jax.block_until_ready(
        linear_logsoftmax(x2, w2, bi2, vmem_budget_bytes=300 * 1024))
    ref2 = jax.nn.log_softmax(
        jnp.dot(x2, w2, precision=jax.lax.Precision.HIGHEST) + bi2, axis=1)
    assert out2.shape == (b2, c2)
    assert jnp.allclose(out2, ref2, atol=1e-4, rtol=1e-4), float(
        jnp.max(jnp.abs(out2 - ref2)))

    print("KERNEL_OK")
</pallas_src>

<mosaic_0001>
module attributes {stable_mosaic.version = 11 : i64} {
  func.func @_resident_kernel(%arg0: i32, %arg1: memref<8x32xf32, #tpu.memory_space<vmem>>, %arg2: memref<32x128xf32, #tpu.memory_space<vmem>>, %arg3: memref<1x128xf32, #tpu.memory_space<vmem>>, %arg4: memref<8x128xf32, #tpu.memory_space<vmem>>) attributes {dimension_semantics = [#tpu.dimension_semantics<parallel>], iteration_bounds = array<i64: 1>, scalar_prefetch = 0 : i64, scratch_operands = 0 : i64, tpu.core_type = #tpu.core_type<tc>, window_params = [{transform_indices = @transform_0, window_bounds = array<i64: 8, 32>}, {pipeline_mode = #tpu.pipeline_mode<synchronous>, transform_indices = @transform_1, window_bounds = array<i64: 32, 128>}, {pipeline_mode = #tpu.pipeline_mode<synchronous>, transform_indices = @transform_2, window_bounds = array<i64: 1, 128>}, {transform_indices = @transform_3, window_bounds = array<i64: 8, 128>}]} {
    %c0 = arith.constant 0 : index
    %c0_0 = arith.constant 0 : index
    %0 = vector.load %arg1[%c0, %c0_0] : memref<8x32xf32, #tpu.memory_space<vmem>>, vector<8x32xf32>
    %c0_1 = arith.constant 0 : index
    %c0_2 = arith.constant 0 : index
    %1 = vector.load %arg2[%c0_1, %c0_2] : memref<32x128xf32, #tpu.memory_space<vmem>>, vector<32x128xf32>
    %cst = arith.constant dense<0.000000e+00> : vector<8x128xf32>
    %2 = tpu.matmul %0, %1, %cst {dimension_numbers = #tpu.dot_dimension_numbers<[1], [0], [0], [1], [0, 0, 1, 1], [], []>} : vector<8x32xf32>, vector<32x128xf32>, vector<8x128xf32> -> vector<8x128xf32>
    %c0_3 = arith.constant 0 : index
    %c0_4 = arith.constant 0 : index
    %3 = vector.load %arg3[%c0_3, %c0_4] : memref<1x128xf32, #tpu.memory_space<vmem>>, vector<1x128xf32>
    %4 = vector.broadcast %3 : vector<1x128xf32> to vector<8x128xf32>
    %5 = arith.addf %2, %4 : vector<8x128xf32>
    %cst_5 = arith.constant dense<0xFF800000> : vector<8xf32>
    %6 = vector.multi_reduction <maximumf>, %5, %cst_5 [1] : vector<8x128xf32> to vector<8xf32>
    %7 = vector.shape_cast %6 : vector<8xf32> to vector<8x1xf32>
    %8 = vector.broadcast %7 : vector<8x1xf32> to vector<8x128xf32>
    %9 = arith.subf %5, %8 : vector<8x128xf32>
    %10 = math.exp %9 : vector<8x128xf32>
    %cst_6 = arith.constant dense<0.000000e+00> : vector<8xf32>
    %11 = vector.multi_reduction <add>, %10, %cst_6 [1] : vector<8x128xf32> to vector<8xf32>
    %12 = vector.shape_cast %11 : vector<8xf32> to vector<8x1xf32>
    %13 = math.log %12 : vector<8x1xf32>
    %14 = vector.broadcast %13 : vector<8x1xf32> to vector<8x128xf32>
    %15 = arith.subf %9, %14 : vector<8x128xf32>
    %c0_7 = arith.constant 0 : index
    %c0_8 = arith.constant 0 : index
    %16 = vector.load %arg4[%c0_7, %c0_8] : memref<8x128xf32, #tpu.memory_space<vmem>>, vector<8x128xf32>
    tpu.vector_store %arg4[%c0_7, %c0_8], %15 {strides = array<i32>} : memref<8x128xf32, #tpu.memory_space<vmem>>, vector<8x128xf32>,
    return
  }
  func.func @transform_0(%arg0: i32) -> (i32, i32) {
    %c0_i32 = arith.constant 0 : i32
    %c0_i32_0 = arith.constant 0 : i32
    return %arg0, %c0_i32 : i32, i32
  }
  func.func @transform_1(%arg0: i32) -> (i32, i32) {
    %c0_i32 = arith.constant 0 : i32
    %c0_i32_0 = arith.constant 0 : i32
    %c0_i32_1 = arith.constant 0 : i32
    return %c0_i32, %c0_i32_0 : i32, i32
  }
  func.func @transform_2(%arg0: i32) -> (i32, i32) {
    %c0_i32 = arith.constant 0 : i32
    %c0_i32_0 = arith.constant 0 : i32
    %c0_i32_1 = arith.constant 0 : i32
    return %c0_i32, %c0_i32_0 : i32, i32
  }
  func.func @transform_3(%arg0: i32) -> (i32, i32) {
    %c0_i32 = arith.constant 0 : i32
    %c0_i32_0 = arith.constant 0 : i32
    return %arg0, %c0_i32 : i32, i32
  }
}

</mosaic_0001>

<bundles_post_ra>
// kernel: tpu_custom_call.1
= control target key start
LH: loop header
LB: loop body
LE: loop exit
PB: predicated region body
PF: predicated region fallthrough
CT: control target
= control target key end

     0   :  { %8 = vsyncpa [#allocation3], 0  ;;  %s336_s0 = inlined_call_operand.hbm [shape: f32[8,32], index: 0, kind: input, shape index: {}]   ;;  %s337_s1 = inlined_call_operand.hbm [shape: f32[32,128], index: 1, kind: input, shape index: {}]   ;;  %s338_s2 = inlined_call_operand.vmem [shape: f32[1,128], index: 2, kind: input, shape index: {}]   ;;  %s339_s3 = inlined_call_operand.hbm [shape: f32[8,128], index: 3, kind: output, shape index: {}]  }
   0x1   :  { %9 = vsyncpa [#allocation6], 0 }
   0x2   :  { %10 = vsyncpa [#allocation4], 0  ;;  %s262_s12 = smov [#allocation2]   ;;  %s263_s14 = smov [#allocation5]  }
   0x3   :  { %s17_s13 = sshll.u32 %s262_s12, 4  ;;  %s26_s15 = sshll.u32 %s263_s14, 4  ;;  %s18_s13 = int_to_ptr.vmem [resolvable:$true] %s17_s13  ;;  %s290_s15 = int_to_ptr.vmem [resolvable:$true] %s26_s15 }
   0x4   :  { %s190_s18 = scalar_lea.hbm %s336_s0, 128 }
   0x5   :  { %p191_p0 = scmp.ne.s32.totalorder %s336_s0, %s190_s18  ;;  %p194_p1 = scmp.lt.u32.totalorder %s190_s18, %s336_s0 }
   0x7   :  { %p196_p2 = pnand %p194_p1, %p191_p0 }
   0x9   :  { %199 = shalt.err (!%p196_p2)
}
   0xa   :  { %s200_s23 = scalar_lea.vmem %s18_s13, 128  ;;  %p205_p4 = scmp.lt.s32.totalorder %s18_s13, %s18_s13 }
   0xb   :  { %p201_p3 = scmp.ne.s32.totalorder %s18_s13, %s200_s23  ;;  %p206_p5 = scmp.lt.s32.totalorder %s200_s23, %s200_s23 }
   0xd   :  { %p207_p6 = por %p206_p5, %p205_p4 }
   0xf   :  { %p208_p7 = pnand %p207_p6, %p201_p3 }
  0x11   :  { %211 = shalt.err (!%p208_p7)
}
  0x12   :  { %20 = dma.hbm_to_vmem [thread:$0]  %s336_s0, 128, %s18_s13, [#allocation3]  }
  0x13   :  { %s212_s28 = scalar_lea.hbm %s337_s1, 512 }
  0x14   :  { %p213_p8 = scmp.ne.s32.totalorder %s337_s1, %s212_s28  ;;  %p216_p9 = scmp.lt.u32.totalorder %s212_s28, %s337_s1 }
  0x16   :  { %p218_p10 = pnand %p216_p9, %p213_p8 }
  0x18   :  { %221 = shalt.err (!%p218_p10)
}
  0x19   :  { %s222_s6 = scalar_lea.vmem %s290_s15, 512  ;;  %p227_p12 = scmp.lt.s32.totalorder %s290_s15, %s290_s15 }
  0x1a   :  { %p223_p11 = scmp.ne.s32.totalorder %s290_s15, %s222_s6  ;;  %p228_p13 = scmp.lt.s32.totalorder %s222_s6, %s222_s6 }
  0x1c   :  { %p229_p0 = por %p228_p13, %p227_p12 }
  0x1e   :  { %p230_p1 = pnand %p229_p0, %p223_p11 }
  0x20   :  { %233 = shalt.err (!%p230_p1)
}
  0x21   :  { %s264_s0 = smov 128   ;;  %s265_s7 = smov 8  }
  0x22   :  { %32 = dma.hbm_to_vmem [thread:$0]  %s337_s1, 512, %s290_s15, [#allocation6], %s264_s0, %s264_s0, %s265_s7  }
  0x23   :  { %256 = dma.done.wait [#allocation3], 128  }
  0x24   :  { %257 = vsyncadd [#allocation3], 4294967168 }
  0x25   :  { %258 = dma.done.wait [#allocation6], 512  }
  0x26   :  { %259 = vsyncadd [#allocation6], 4294966784  ;;  %v266_v0 = vmov 0.0|0.0   ;;  %vm267_vm0 = vmmov 0   ;;  %v268_v1 = vmov 0.0   ;;  %v42_v2 = vld [vmem:[#allocation5] sm:$0xff] }
  0x27   :  { %172 = vmatprep.subr.bf16.mxu0 %v266_v0  ;;  %169 = vmatprep.mubr.msk.f32.mxu0 %vm267_vm0, %v268_v1  ;;  %v43_v3 = vld [vmem:[#allocation5 + $0x8] sm:$0xff]  ;;  %v44_v4 = vld [vmem:[#allocation5 + $0x10] sm:$0xff]  ;;  %v45_v6 = vld [vmem:[#allocation5 + $0x18] sm:$0xff]  ;;  %vm53_vm1 = vcmask 261120   ;;  %s269_s11 = smov [#allocation7]  }
  0x28   :  { %v173_v5 = vpack.c.bf16 %v43_v3, %v42_v2  ;;  %v176_v7 = vpack.c.bf16 %v45_v6, %v44_v4  ;;  %v41_v8 = vld [vmem:[#allocation2] sm:$0xff]  ;;  %s144_s12 = sshll.u32 %s269_s11, 4  ;;  %s145_s12 = int_to_ptr.vmem [resolvable:$true] %s144_s12 }
  0x29   :  { %v154_v9 = vld [vmem:[%s338_s2] ss:$0 sm:$0xff]  ;;  %s234_s2 = scalar_lea.vmem %s145_s12, 128  ;;  %p239_p3 = scmp.lt.s32.totalorder %s145_s12, %s145_s12 }
  0x2a   :  { %174 = vmatpush3.bf16.msra.mxu0 %v173_v5  ;;  %p235_p2 = scmp.ne.s32.totalorder %s145_s12, %s234_s2  ;;  %p240_p4 = scmp.lt.s32.totalorder %s234_s2, %s234_s2 }
  0x2b   :  { %175 = vmatprep.subr.bf16.mxu0 %v266_v0 }
  0x2c   :  { %p241_p5 = por %p240_p4, %p239_p3 }
  0x2e   :  { %177 = vmatpush3.bf16.msra.mxu0 %v176_v7  ;;  %p242_p6 = pnand %p241_p5, %p235_p2 }
  0x31   :  { %170 = vmatmul.mubr.msk.f32.vlgmr.msra.gmra.mrb[0].mxu0 %vm53_vm1, %v41_v8 }
 0x104   :  { %v123_v10 = vpop.f32.mrb[0].mxu0 }
 0x105   :  { %v124_v11 = vadd.f32 %v154_v9, %v123_v10  ;;  %v171_v12 = vpop.f32.mrb[1].mxu0 }
 0x107   :  { %127 = vmax.xlane.f32.xlu0 %v124_v11 }
 0x194   :  { %v128_v13 = vpop.xlane.xlu0 %127 }
 0x195   :  { %v129_v14 = vsub.f32 %v124_v11, %v128_v13 }
 0x197   :  { %v130_v15 = vmul.f32 1.442695, %v129_v14 }
 0x199   :  { %186 = vpow2.f32 %v130_v15 }
 0x1a3   :  { %v187_v16 = vpop.eup %186 }
 0x1a4   :  { %132 = vadd.xlane.f32.xlu0 %v187_v16 }
 0x231   :  { %v133_v17 = vpop.xlane.xlu0 %132 }
 0x232   :  { %188 = vlog2.f32 %v133_v17 }
 0x23c   :  { %v189_v18 = vpop.eup %188 }
 0x23d   :  { %v135_v19 = vmul.f32 0.6931472, %v189_v18 }
 0x23f   :  { %v136_v20 = vsub.f32 %v129_v14, %v135_v19 }
 0x241   :  { %137 = vst [vmem:[#allocation7] sm:$0xff] %v136_v20 }
 0x242   :  { %245 = shalt.err (!%p242_p6)
}
 0x243   :  { %s246_s15 = scalar_lea.hbm %s339_s3, 128 }
 0x244   :  { %p247_p7 = scmp.ne.s32.totalorder %s339_s3, %s246_s15  ;;  %p250_p8 = scmp.lt.u32.totalorder %s246_s15, %s339_s3 }
 0x246   :  { %p252_p9 = pnand %p250_p8, %p247_p7 }
 0x248   :  { %255 = shalt.err (!%p252_p9)
}
 0x249   :  { %147 = dma.vmem_to_hbm [thread:$0]  %s145_s12, 128, %s339_s3, [#allocation4]  }
 0x24a   :  { %260 = dma.done.wait [#allocation4], 128  }
 0x24b   :  { %261 = vsyncadd [#allocation4], 4294967168 }
 0x24c   :  { %151 = vsyncpa [#allocation3], 1 }
 0x24d   :  { %152 = vsyncpa [#allocation6], 1 }
 0x24e   :  { %153 = vsyncpa [#allocation4], 1 }

</bundles_post_ra>
